<compile_context>
chip_gen: v5e
topology: v5e:2x2
jax: 0.10.0
libtpu: 0.0.40
codegen_flags: <defaults>
</compile_context>

<pallas_src>
import functools

import jax
import jax.numpy as jnp
from jax.experimental import pallas as pl
from jax.experimental.pallas import tpu as pltpu

_LANE = 128


def _wbn1d_kernel(eps, x_ref, ws_ref, wnt_ref, gamma_ref, beta_ref, o_ref):
    """One C-tile of the WBN1d training-mode forward.

    x_ref     : (N, TC)   input tile
    ws_ref    : (N, Kp)   raw per-sample domain weights (zero-padded to Kp)
    wnt_ref   : (Kp, N)   column-normalized weights, transposed (real rows sum to 1)
    gamma_ref : (1, TC)   affine scale tile
    beta_ref  : (1, TC)   affine shift tile
    o_ref     : (N, TC)   output tile
    """
    x = x_ref[...].astype(jnp.float32)          # (N, TC)
    ws = ws_ref[...].astype(jnp.float32)        # (N, Kp)
    wnt = wnt_ref[...].astype(jnp.float32)      # (Kp, N)

    # Weighted per-channel first / second moments on the MXU:
    #   mean[i, c] = sum_n wn[n, i] * x[n, c]
    #   ex2 [i, c] = sum_n wn[n, i] * x[n, c]^2
    mean = jnp.dot(wnt, x, preferred_element_type=jnp.float32)        # (Kp, TC)
    ex2 = jnp.dot(wnt, x * x, preferred_element_type=jnp.float32)     # (Kp, TC)
    var = jnp.maximum(ex2 - mean * mean, 0.0)
    inv = jax.lax.rsqrt(var + eps)                                    # (Kp, TC)

    # y[n, c] = sum_i ws[n, i] * (x[n, c] - mean[i, c]) * inv[i, c]
    #         = x[n, c] * A[n, c] - B[n, c]
    a = jnp.dot(ws, inv, preferred_element_type=jnp.float32)          # (N, TC)
    b = jnp.dot(ws, mean * inv, preferred_element_type=jnp.float32)   # (N, TC)

    gamma = gamma_ref[...].astype(jnp.float32)                        # (1, TC)
    beta = beta_ref[...].astype(jnp.float32)                          # (1, TC)
    o_ref[...] = (gamma * (x * a - b) + beta).astype(o_ref.dtype)


def wbn1d_forward(x, ws, gamma, beta, eps=1e-5):
    """x: (N, C), ws: (N, K), gamma/beta: (C,). Returns (N, C)."""
    n, c = x.shape
    k = ws.shape[1]

    # ---- host-side prep (cheap, O(N*K) / O(C)) --------------------------------
    ws_f32 = ws.astype(jnp.float32)
    wn = ws_f32 / jnp.sum(ws_f32, axis=0, keepdims=True)        # column-normalized
    k_pad = max(8, pl.cdiv(k, 8) * 8)                           # sublane-friendly K
    ws_p = jnp.zeros((n, k_pad), jnp.float32).at[:, :k].set(ws_f32)
    wnt_p = jnp.zeros((k_pad, n), jnp.float32).at[:k, :].set(wn.T)

    # Lane-dense channel padding + tile choice (VMEM-budgeted, multiple of 128).
    c128 = pl.cdiv(c, _LANE) * _LANE
    budget = 4 << 20                                            # ~4 MiB per f32 x-tile
    tc = max(_LANE, min(1024, (budget // (max(n, 1) * 4)) // _LANE * _LANE))
    tc = min(tc, c128)
    c_pad = pl.cdiv(c128, tc) * tc

    x_p = jnp.zeros((n, c_pad), x.dtype).at[:, :c].set(x)
    gamma_p = jnp.ones((1, c_pad), jnp.float32).at[0, :c].set(gamma.astype(jnp.float32))
    beta_p = jnp.zeros((1, c_pad), jnp.float32).at[0, :c].set(beta.astype(jnp.float32))

    grid = (c_pad // tc,)

    out = pl.pallas_call(
        functools.partial(_wbn1d_kernel, eps),
        out_shape=jax.ShapeDtypeStruct((n, c_pad), x.dtype),
        grid=grid,
        in_specs=[
            pl.BlockSpec((n, tc), lambda j: (0, j)),       # x tile
            pl.BlockSpec((n, k_pad), lambda j: (0, 0)),    # raw weights (untiled)
            pl.BlockSpec((k_pad, n), lambda j: (0, 0)),    # normalized weights^T
            pl.BlockSpec((1, tc), lambda j: (0, j)),       # gamma tile
            pl.BlockSpec((1, tc), lambda j: (0, j)),       # beta tile
        ],
        out_specs=pl.BlockSpec((n, tc), lambda j: (0, j)),
        compiler_params=pltpu.CompilerParams(
            dimension_semantics=("parallel",),
            vmem_limit_bytes=32 * 1024 * 1024,
        ),
    )(x_p, ws_p, wnt_p, gamma_p, beta_p)

    return out[:, :c]


def wbn1d_reference(x, ws, gamma, beta, eps=1e-5):
    """Pure-JAX reference mirroring the PyTorch WBN1d.forward (training mode)."""
    x = x.astype(jnp.float32)
    ws = ws.astype(jnp.float32)
    y = jnp.zeros_like(x)
    for i in range(ws.shape[1]):
        w = ws[:, i]
        wn = w / jnp.sum(w)
        mean = jnp.sum(wn[:, None] * x, axis=0)
        var = jnp.sum(wn[:, None] * (x - mean[None, :]) ** 2, axis=0)
        xhat = (x - mean[None, :]) / jnp.sqrt(var[None, :] + eps)
        y = y + w[:, None] * xhat
    return gamma[None, :] * y + beta[None, :]


if __name__ == "__main__":
    N, C, K = 8, 32, 2

    key = jax.random.PRNGKey(0)
    kx, kw = jax.random.split(key)
    x = jax.random.normal(kx, (N, C), dtype=jnp.float32)
    # Latent-domain assignment weights: positive, like softmax output of a
    # domain classifier (matches typical usage of WBN1d).
    ws = jax.nn.softmax(jax.random.normal(kw, (N, K), dtype=jnp.float32), axis=1)

    # Deterministic parameter init, per WBN1d.reset_parameters (affine=True).
    gamma = jnp.ones((C,), dtype=jnp.float32)
    beta = jnp.zeros((C,), dtype=jnp.float32)

    out = wbn1d_forward(x, ws, gamma, beta)
    out = jax.block_until_ready(out)

    ref = wbn1d_reference(x, ws, gamma, beta)
    assert out.shape == (N, C)
    assert jnp.allclose(out, ref, atol=1e-4, rtol=1e-4), "mismatch vs reference"

    print("KERNEL_OK")
</pallas_src>

<mosaic_0001>
module attributes {stable_mosaic.version = 11 : i64} {
  func.func @_wbn1d_kernel(%arg0: i32, %arg1: memref<8x128xf32, #tpu.memory_space<vmem>>, %arg2: memref<8x8xf32, #tpu.memory_space<vmem>>, %arg3: memref<8x8xf32, #tpu.memory_space<vmem>>, %arg4: memref<1x128xf32, #tpu.memory_space<vmem>>, %arg5: memref<1x128xf32, #tpu.memory_space<vmem>>, %arg6: memref<8x128xf32, #tpu.memory_space<vmem>>) attributes {dimension_semantics = [#tpu.dimension_semantics<parallel>], iteration_bounds = array<i64: 1>, scalar_prefetch = 0 : i64, scratch_operands = 0 : i64, tpu.core_type = #tpu.core_type<tc>, window_params = [{transform_indices = @transform_0, window_bounds = array<i64: 8, 128>}, {pipeline_mode = #tpu.pipeline_mode<synchronous>, transform_indices = @transform_1, window_bounds = array<i64: 8, 8>}, {pipeline_mode = #tpu.pipeline_mode<synchronous>, transform_indices = @transform_2, window_bounds = array<i64: 8, 8>}, {transform_indices = @transform_3, window_bounds = array<i64: 1, 128>}, {transform_indices = @transform_4, window_bounds = array<i64: 1, 128>}, {transform_indices = @transform_5, window_bounds = array<i64: 8, 128>}]} {
    %c0 = arith.constant 0 : index
    %c0_0 = arith.constant 0 : index
    %0 = vector.load %arg1[%c0, %c0_0] : memref<8x128xf32, #tpu.memory_space<vmem>>, vector<8x128xf32>
    %c0_1 = arith.constant 0 : index
    %c0_2 = arith.constant 0 : index
    %1 = vector.load %arg2[%c0_1, %c0_2] : memref<8x8xf32, #tpu.memory_space<vmem>>, vector<8x8xf32>
    %c0_3 = arith.constant 0 : index
    %c0_4 = arith.constant 0 : index
    %2 = vector.load %arg3[%c0_3, %c0_4] : memref<8x8xf32, #tpu.memory_space<vmem>>, vector<8x8xf32>
    %cst = arith.constant dense<0.000000e+00> : vector<8x128xf32>
    %3 = tpu.matmul %2, %0, %cst {dimension_numbers = #tpu.dot_dimension_numbers<[1], [0], [0], [1], [0, 0, 1, 1], [], []>} : vector<8x8xf32>, vector<8x128xf32>, vector<8x128xf32> -> vector<8x128xf32>
    %4 = arith.mulf %0, %0 : vector<8x128xf32>
    %cst_5 = arith.constant dense<0.000000e+00> : vector<8x128xf32>
    %5 = tpu.matmul %2, %4, %cst_5 {dimension_numbers = #tpu.dot_dimension_numbers<[1], [0], [0], [1], [0, 0, 1, 1], [], []>} : vector<8x8xf32>, vector<8x128xf32>, vector<8x128xf32> -> vector<8x128xf32>
    %6 = arith.mulf %3, %3 : vector<8x128xf32>
    %7 = arith.subf %5, %6 : vector<8x128xf32>
    %cst_6 = arith.constant 0.000000e+00 : f32
    %8 = vector.broadcast %cst_6 : f32 to vector<8x128xf32>
    %9 = arith.maximumf %7, %8 : vector<8x128xf32>
    %cst_7 = arith.constant 9.99999974E-6 : f32
    %10 = vector.broadcast %cst_7 : f32 to vector<8x128xf32>
    %11 = arith.addf %9, %10 : vector<8x128xf32>
    %12 = math.rsqrt %11 : vector<8x128xf32>
    %cst_8 = arith.constant dense<0.000000e+00> : vector<8x128xf32>
    %13 = tpu.matmul %1, %12, %cst_8 {dimension_numbers = #tpu.dot_dimension_numbers<[1], [0], [0], [1], [0, 0, 1, 1], [], []>} : vector<8x8xf32>, vector<8x128xf32>, vector<8x128xf32> -> vector<8x128xf32>
    %14 = arith.mulf %3, %12 : vector<8x128xf32>
    %cst_9 = arith.constant dense<0.000000e+00> : vector<8x128xf32>
    %15 = tpu.matmul %1, %14, %cst_9 {dimension_numbers = #tpu.dot_dimension_numbers<[1], [0], [0], [1], [0, 0, 1, 1], [], []>} : vector<8x8xf32>, vector<8x128xf32>, vector<8x128xf32> -> vector<8x128xf32>
    %c0_10 = arith.constant 0 : index
    %c0_11 = arith.constant 0 : index
    %16 = vector.load %arg4[%c0_10, %c0_11] : memref<1x128xf32, #tpu.memory_space<vmem>>, vector<1x128xf32>
    %c0_12 = arith.constant 0 : index
    %c0_13 = arith.constant 0 : index
    %17 = vector.load %arg5[%c0_12, %c0_13] : memref<1x128xf32, #tpu.memory_space<vmem>>, vector<1x128xf32>
    %18 = arith.mulf %0, %13 : vector<8x128xf32>
    %19 = arith.subf %18, %15 : vector<8x128xf32>
    %20 = vector.broadcast %16 : vector<1x128xf32> to vector<8x128xf32>
    %21 = arith.mulf %20, %19 : vector<8x128xf32>
    %22 = vector.broadcast %17 : vector<1x128xf32> to vector<8x128xf32>
    %23 = arith.addf %21, %22 : vector<8x128xf32>
    %c0_14 = arith.constant 0 : index
    %c0_15 = arith.constant 0 : index
    %24 = vector.load %arg6[%c0_14, %c0_15] : memref<8x128xf32, #tpu.memory_space<vmem>>, vector<8x128xf32>
    tpu.vector_store %arg6[%c0_14, %c0_15], %23 {strides = array<i32>} : memref<8x128xf32, #tpu.memory_space<vmem>>, vector<8x128xf32>,
    return
  }
  func.func @transform_0(%arg0: i32) -> (i32, i32) {
    %c0_i32 = arith.constant 0 : i32
    %c0_i32_0 = arith.constant 0 : i32
    return %c0_i32, %arg0 : i32, i32
  }
  func.func @transform_1(%arg0: i32) -> (i32, i32) {
    %c0_i32 = arith.constant 0 : i32
    %c0_i32_0 = arith.constant 0 : i32
    %c0_i32_1 = arith.constant 0 : i32
    return %c0_i32, %c0_i32_0 : i32, i32
  }
  func.func @transform_2(%arg0: i32) -> (i32, i32) {
    %c0_i32 = arith.constant 0 : i32
    %c0_i32_0 = arith.constant 0 : i32
    %c0_i32_1 = arith.constant 0 : i32
    return %c0_i32, %c0_i32_0 : i32, i32
  }
  func.func @transform_3(%arg0: i32) -> (i32, i32) {
    %c0_i32 = arith.constant 0 : i32
    %c0_i32_0 = arith.constant 0 : i32
    return %c0_i32, %arg0 : i32, i32
  }
  func.func @transform_4(%arg0: i32) -> (i32, i32) {
    %c0_i32 = arith.constant 0 : i32
    %c0_i32_0 = arith.constant 0 : i32
    return %c0_i32, %arg0 : i32, i32
  }
  func.func @transform_5(%arg0: i32) -> (i32, i32) {
    %c0_i32 = arith.constant 0 : i32
    %c0_i32_0 = arith.constant 0 : i32
    return %c0_i32, %arg0 : i32, i32
  }
}

</mosaic_0001>

<bundles_post_ra>
// kernel: tpu_custom_call.1
= control target key start
LH: loop header
LB: loop body
LE: loop exit
PB: predicated region body
PF: predicated region fallthrough
CT: control target
= control target key end

     0   :  { %10 = vsyncpa [#allocation3], 0  ;;  %s369_s0 = inlined_call_operand.hbm [shape: f32[8,128], index: 0, kind: input, shape index: {}]   ;;  %s370_s1 = inlined_call_operand.hbm [shape: f32[8,8], index: 1, kind: input, shape index: {}]   ;;  %s371_s2 = inlined_call_operand.hbm [shape: f32[8,8], index: 2, kind: input, shape index: {}]   ;;  %s372_s3 = inlined_call_operand.vmem [shape: f32[1,128], index: 3, kind: input, shape index: {}]   ;;  %s373_s4 = inlined_call_operand.vmem [shape: f32[1,128], index: 4, kind: input, shape index: {}]   ;;  %s374_s5 = inlined_call_operand.hbm [shape: f32[8,128], index: 5, kind: output, shape index: {}]  }
   0x1   :  { %11 = vsyncpa [#allocation6], 0  ;;  %s29_s20 = sshll.u32 %s370_s1, 4  ;;  %s30_s20 = int_to_ptr.hbm [resolvable:$true] %s29_s20 }
   0x2   :  { %12 = vsyncpa [#allocation4], 0  ;;  %s313_s21 = smov [#allocation5]   ;;  %s18_s25 = sshll.u32 %s369_s0, 4  ;;  %s19_s25 = int_to_ptr.hbm [resolvable:$true] %s18_s25 }
   0x3   :  { %s31_s22 = sshll.u32 %s313_s21, 4  ;;  %s314_s26 = smov [#allocation2]   ;;  %s32_s22 = int_to_ptr.vmem [resolvable:$true] %s31_s22 }
   0x4   :  { %34 = dma.hbm_to_vmem [thread:$0]  %s30_s20, 128, %s32_s22, [#allocation6]  }
   0x5   :  { %s20_s27 = sshll.u32 %s314_s26, 4  ;;  %s40_s30 = sshll.u32 %s371_s2, 4  ;;  %s21_s27 = int_to_ptr.vmem [resolvable:$true] %s20_s27  ;;  %s41_s30 = int_to_ptr.hbm [resolvable:$true] %s40_s30 }
   0x6   :  { %23 = dma.hbm_to_vmem [thread:$0]  %s19_s25, 128, %s21_s27, [#allocation3]  }
   0x7   :  { %s315_s1 = smov [#allocation7]  }
   0x8   :  { %s42_s6 = sshll.u32 %s315_s1, 4  ;;  %s43_s6 = int_to_ptr.vmem [resolvable:$true] %s42_s6 }
   0x9   :  { %45 = dma.hbm_to_vmem [thread:$0]  %s41_s30, 128, %s43_s6, [#allocation6]  }
   0xa   :  { %307 = dma.done.wait [#allocation3], 128  }
   0xb   :  { %308 = vsyncadd [#allocation3], 4294967168 }
   0xc   :  { %309 = dma.done.wait [#allocation6], 256  }
   0xd   :  { %310 = vsyncadd [#allocation6], 4294967040  ;;  %vm65_vm0 = vcmask 64512   ;;  %v62_v0 = vld [vmem:[#allocation2] sm:$0xff]  ;;  %v64_v1 = vld [vmem:[#allocation7] sm:$0xff]  ;;  %s316_s9 = smov [#allocation8]  }
   0xe   :  { %84 = vmatpush.msra.mxu0 %v62_v0  ;;  %v89_v2 = vmul.f32 %v62_v0, %v62_v0  ;;  %v63_v15 = vld [vmem:[#allocation5] sm:$0xff]  ;;  %v207_v20 = vld [vmem:[%s372_s3] ss:$0 sm:$0xff]  ;;  %s186_s10 = sshll.u32 %s316_s9, 4  ;;  %s188_s13 = sshll.u32 %s374_s5, 4  ;;  %s187_s10 = int_to_ptr.vmem [resolvable:$true] %s186_s10  ;;  %s189_s13 = int_to_ptr.hbm [resolvable:$true] %s188_s13 }
   0xf   :  { %199 = vmatmul.msk.f32.vlgmr.msra.gmra.mxu0 %vm65_vm0, %v64_v1  ;;  %v208_v23 = vld [vmem:[%s373_s4] ss:$0 sm:$0xff] }
  0x10   :  { %105 = vmatpush.msra.mxu1 %v89_v2 }
  0x11   :  { %200 = vmatmul.msk.f32.vlgmr.msra.gmra.mxu1 %vm65_vm0, %v64_v1 }
  0x8c   :  { %v86_v3 = vpop.f32.mrf.mxu0 }
  0x8d   :  { %v110_v4 = vmul.f32 %v86_v3, %v86_v3 }
  0x8e   :  { %v107_v5 = vpop.f32.mrf.mxu1 }
  0x8f   :  { %v111_v6 = vsub.f32 %v107_v5, %v110_v4 }
  0x91   :  { %v112_v7 = vmax.f32 %v111_v6, 0.0 }
  0x93   :  { %v113_v8 = vadd.f32 1e-05, %v112_v7 }
  0x95   :  { %209 = vrsqrt.f32 %v113_v8  ;;  %vm120_vm2 = vweird.f32 %v113_v8 }
  0x9b   :  { %v210_v9 = vpop.eup %209 }
  0x9c   :  { %v115_v10 = vmul.f32 %v210_v9, %v113_v8  ;;  %vm121_vm1 = vweird.f32 %v210_v9 }
  0x9d   :  { %vm122_vm3 = vmor %vm120_vm2, %vm121_vm1 }
  0x9e   :  { %v116_v11 = vmul.f32 %v210_v9, %v115_v10 }
  0xa0   :  { %v117_v12 = vmul.f32 0.5, %v116_v11 }
  0xa2   :  { %v118_v13 = vsub.f32 1.5, %v117_v12 }
  0xa4   :  { %v119_v14 = vmul.f32 %v210_v9, %v118_v13 }
  0xa6   :  { %v123_v16 = vsel %vm122_vm3, %v210_v9, %v119_v14 }
  0xa7   :  { %142 = vmatpush.msra.mxu2 %v123_v16  ;;  %v147_v17 = vmul.f32 %v123_v16, %v86_v3 }
  0xa8   :  { %201 = vmatmul.msk.f32.vlgmr.msra.gmra.mxu2 %vm65_vm0, %v63_v15 }
  0xa9   :  { %163 = vmatpush.msra.mxu3 %v147_v17 }
  0xaa   :  { %202 = vmatmul.msk.f32.vlgmr.msra.gmra.mxu3 %vm65_vm0, %v63_v15 }
 0x12b   :  { %v144_v18 = vpop.f32.mrf.mxu2 }
 0x12c   :  { %v170_v19 = vmul.f32 %v144_v18, %v62_v0 }
 0x12d   :  { %v165_v21 = vpop.f32.mrf.mxu3 }
 0x12e   :  { %v171_v22 = vsub.f32 %v170_v19, %v165_v21 }
 0x130   :  { %v175_v24 = vmul.f32 %v207_v20, %v171_v22 }
 0x132   :  { %v179_v25 = vadd.f32 %v208_v23, %v175_v24 }
 0x134   :  { %180 = vst [vmem:[#allocation8] sm:$0xff] %v179_v25 }
 0x135   :  { %191 = dma.vmem_to_hbm [thread:$0]  %s187_s10, 128, %s189_s13, [#allocation4]  }
 0x136   :  { %311 = dma.done.wait [#allocation4], 128  }
 0x137   :  { %312 = vsyncadd [#allocation4], 4294967168 }
 0x138   :  { %196 = vsyncpa [#allocation3], 1 }
 0x139   :  { %197 = vsyncpa [#allocation6], 1 }
 0x13a   :  { %198 = vsyncpa [#allocation4], 1 }

</bundles_post_ra>
